<compile_context>
chip_gen: v7x
topology: tpu7x:2x2x1
jax: 0.10.0
libtpu: 0.0.40
codegen_flags: <defaults>
</compile_context>

<pallas_src>
import functools

import jax
import jax.numpy as jnp
from jax.experimental import pallas as pl
from jax.experimental.pallas import tpu as pltpu

_LANE = 128


def _sigmoid_kernel(x_ref, o_ref, *, low, rng, fast_recip):
    x32 = x_ref[...].astype(jnp.float32)
    if fast_recip:
        # Narrow (bf16/fp16/fp8) outputs: keep exp + reciprocal on the EUP slot
        # so the kernel stays HBM-bound on v7x.  Approx reciprocal error
        # (~1e-4 rel) is far below the output dtype's resolution.  The clamp
        # avoids exp overflow -> reciprocal(inf).
        z = jnp.exp(-jnp.maximum(x32, -88.0))
        s = pl.reciprocal(1.0 + z, approx=True)
    else:
        # f32 outputs: exact sigmoid.
        s = jax.nn.sigmoid(x32)
    if low is not None:
        s = s * rng + low
    o_ref[...] = s.astype(o_ref.dtype)


def _sigmoid_jnp(x, low, rng):
    """Plain-JAX path for <128-element tails / degenerate tiny inputs."""
    s = jax.nn.sigmoid(x.astype(jnp.float32))
    if low is not None:
        s = s * rng + low
    return s.astype(x.dtype)


def _default_block_bytes():
    """Generation-aware block size: ~2 MiB on v7x (64 MiB VMEM/TC), 4 MiB else."""
    try:
        info = pltpu.get_tpu_info()
        vmem = getattr(info, "vmem_capacity_bytes", None)
        if vmem is not None and vmem <= 80 * 1024 * 1024:
            return 2 * 1024 * 1024
    except Exception:
        pass
    return 4 * 1024 * 1024


def pallas_sigmoid(x, out_range=None, *, target_block_bytes=None):
    """Elementwise sigmoid (optionally rescaled to `out_range`) on TPU.

    `out_range`, if given, must be Python numbers (as in the nn.Module ctor);
    they are baked into the kernel as compile-time constants.
    """
    if out_range is not None:
        low, high = out_range
        rng = high - low
    else:
        low, rng = None, None

    orig_shape = x.shape
    dtype = x.dtype
    n = x.size
    itemsize = jnp.dtype(dtype).itemsize
    # Minimum sublane granularity: 8 rows (32-bit), 16 (16-bit), 32 (8-bit).
    row_align = max(8, 32 // itemsize)

    rows = n // _LANE
    if rows == 0:
        # Degenerate tiny input (< 128 elements): not worth a kernel launch.
        return jnp.reshape(_sigmoid_jnp(jnp.reshape(x, (-1,)), low, rng),
                           orig_shape)

    n_main = rows * _LANE
    x_flat = jnp.reshape(x, (-1,))
    x2d = jnp.reshape(x_flat[:n_main], (rows, _LANE))

    if target_block_bytes is None:
        target_block_bytes = _default_block_bytes()

    # Block-row count: large blocks rounded down to the sublane alignment,
    # capped so the grid has >=2 steps whenever rows > row_align (lets the
    # "parallel" grid axis split across both v7x TensorCores; harmless loop on
    # v5e/v6e).  A partial final block is clipped/dropped by Pallas.
    target_rows = max(row_align, target_block_bytes // (_LANE * itemsize))
    target_rows = (target_rows // row_align) * row_align
    if rows > row_align:
        half_rows = ((pl.cdiv(rows, 2) + row_align - 1) // row_align) * row_align
        tile_rows = min(target_rows, half_rows, rows)
    else:
        tile_rows = rows  # block == full array dims; always legal
    grid = (pl.cdiv(rows, tile_rows),)

    # VMEM limit from the actual footprint: in+out double-buffered plus
    # headroom for f32 compute temporaries.
    tile_bytes = tile_rows * _LANE * itemsize
    vmem_limit = 2 * (2 * tile_bytes) + 4 * tile_rows * _LANE * 4 + (2 << 20)
    vmem_limit = int(min(48 * 1024 * 1024, max(8 * 1024 * 1024, vmem_limit)))

    kernel = functools.partial(
        _sigmoid_kernel, low=low, rng=rng, fast_recip=(itemsize < 4))

    out2d = pl.pallas_call(
        kernel,
        out_shape=jax.ShapeDtypeStruct((rows, _LANE), dtype),
        grid_spec=pltpu.PrefetchScalarGridSpec(
            num_scalar_prefetch=0,
            grid=grid,
            in_specs=[pl.BlockSpec((tile_rows, _LANE), lambda i: (i, 0))],
            out_specs=pl.BlockSpec((tile_rows, _LANE), lambda i: (i, 0)),
        ),
        compiler_params=pltpu.CompilerParams(
            dimension_semantics=("parallel",),
            vmem_limit_bytes=vmem_limit,
        ),
    )(x2d)

    if n_main == n:
        return jnp.reshape(out2d, orig_shape)
    # Ragged tail (< 128 elements): compute outside the kernel and stitch.
    tail_out = _sigmoid_jnp(x_flat[n_main:], low, rng)
    out_flat = jnp.concatenate([jnp.reshape(out2d, (-1,)), tail_out])
    return jnp.reshape(out_flat, orig_shape)


if __name__ == "__main__":
    key = jax.random.PRNGKey(0)
    # Small NCHW-like input consistent with the module's typical usage.
    x = jax.random.normal(key, (2, 4, 16, 16), dtype=jnp.float32)

    # Case 1: plain sigmoid (out_range=None); grid has 2 steps.
    y = pallas_sigmoid(x)
    jax.block_until_ready(y)
    assert y.shape == x.shape, "shape mismatch"
    assert jnp.allclose(y, jax.nn.sigmoid(x), atol=1e-6), "plain sigmoid mismatch"

    # Case 2: sigmoid rescaled to out_range=(-1.0, 3.0)
    low, high = -1.0, 3.0
    y2 = pallas_sigmoid(x, out_range=(low, high))
    jax.block_until_ready(y2)
    ref2 = jax.nn.sigmoid(x) * (high - low) + low
    assert jnp.allclose(y2, ref2, atol=1e-5), "scaled sigmoid mismatch"

    # Case 3: ragged size -> 128-aligned prefix through the kernel (with a
    # partial final grid block) + <128-element tail fixed up in plain jnp.
    x3 = jax.random.normal(jax.random.PRNGKey(1), (3, 5, 17, 19), jnp.float32)
    y3 = pallas_sigmoid(x3)
    jax.block_until_ready(y3)
    assert y3.shape == x3.shape, "shape mismatch (ragged size)"
    assert jnp.allclose(y3, jax.nn.sigmoid(x3), atol=1e-6), \
        "ragged-size sigmoid mismatch"

    # Case 4: bf16 exercises the EUP exp + approx-reciprocal path.
    xb = x.astype(jnp.bfloat16)
    yb = pallas_sigmoid(xb)
    jax.block_until_ready(yb)
    assert yb.dtype == jnp.bfloat16, "dtype mismatch (bf16)"
    assert jnp.allclose(yb.astype(jnp.float32),
                        jax.nn.sigmoid(xb.astype(jnp.float32)),
                        atol=1e-2), "bf16 sigmoid mismatch"

    print("KERNEL_OK")
</pallas_src>

<mosaic_0001>
module attributes {stable_mosaic.version = 11 : i64} {
  func.func @_sigmoid_kernel(%arg0: i32, %arg1: memref<8x128xf32, #tpu.memory_space<vmem>>, %arg2: memref<8x128xf32, #tpu.memory_space<vmem>>) attributes {dimension_semantics = [#tpu.dimension_semantics<parallel>], iteration_bounds = array<i64: 2>, scalar_prefetch = 0 : i64, scratch_operands = 0 : i64, tpu.core_type = #tpu.core_type<tc>, window_params = [{transform_indices = @transform_0, window_bounds = array<i64: 8, 128>}, {transform_indices = @transform_1, window_bounds = array<i64: 8, 128>}]} {
    %c0 = arith.constant 0 : index
    %c0_0 = arith.constant 0 : index
    %0 = vector.load %arg1[%c0, %c0_0] : memref<8x128xf32, #tpu.memory_space<vmem>>, vector<8x128xf32>
    %1 = arith.negf %0 : vector<8x128xf32>
    %2 = math.exp %1 : vector<8x128xf32>
    %cst = arith.constant 1.000000e+00 : f32
    %3 = vector.broadcast %cst : f32 to vector<8x128xf32>
    %4 = arith.addf %3, %2 : vector<8x128xf32>
    %5 = arith.divf %3, %4 : vector<8x128xf32>
    %c0_1 = arith.constant 0 : index
    %c0_2 = arith.constant 0 : index
    %6 = vector.load %arg2[%c0_1, %c0_2] : memref<8x128xf32, #tpu.memory_space<vmem>>, vector<8x128xf32>
    tpu.vector_store %arg2[%c0_1, %c0_2], %5 {strides = array<i32>} : memref<8x128xf32, #tpu.memory_space<vmem>>, vector<8x128xf32>,
    return
  }
  func.func @transform_0(%arg0: i32) -> (i32, i32) {
    %c0_i32 = arith.constant 0 : i32
    %c0_i32_0 = arith.constant 0 : i32
    return %arg0, %c0_i32 : i32, i32
  }
  func.func @transform_1(%arg0: i32) -> (i32, i32) {
    %c0_i32 = arith.constant 0 : i32
    %c0_i32_0 = arith.constant 0 : i32
    return %arg0, %c0_i32 : i32, i32
  }
}

</mosaic_0001>

<bundles_post_ra>
// kernel: tpu_custom_call.1
= control target key start
LH: loop header
LB: loop body
LE: loop exit
PB: predicated region body
PF: predicated region fallthrough
CT: control target
= control target key end

     0   :  { %6 = vsyncpa [#allocation3], 0  ;;  %s558_s0 = inlined_call_operand.hbm [shape: f32[16,128], index: 0, kind: input, shape index: {}]   ;;  %s559_s1 = inlined_call_operand.hbm [shape: f32[16,128], index: 1, kind: output, shape index: {}]  }
   0x1   :  { %8 = vsyncpa [#allocation3 + $0x1], 0 }
   0x2   :  { %9 = vsyncpa [#allocation4], 0 }
   0x3   :  { %11 = vsyncpa [#allocation4 + $0x1], 0  ;;  %s397_s6 = smov 0   ;;  %s399_s7 = smov 0  }
   0x4   :  { %s401_s8 = smov 0   ;;  %s403_s9 = smov 0  }
   0x5 LB: > { %s418_s10 = sadd.s32 4294967295, %s383_s9   ;;  %s224_s11 = sadd.s32 4294967294, %s383_s9   ;;  %s383_s9 = sphi %s403_s9, %s574_s9   ;;  %s379_s8 = sphi %s401_s8, %s573_s8   ;;  %s375_s7 = sphi %s399_s7, %s572_s7   ;;  %s371_s6 = sphi %s397_s6, %s571_s6  }
   0x6   : > { %s422_s12 = sadd.s32 1, %s383_s9   ;;  %s24_s13 = sadd.s32 1, %s379_s8 }
   0x7   : > { %s21_s14 = ssub.s32 %s383_s9, %s422_s12  ;;  %p31_p0 = scmp.ne.s32.totalorder %s379_s8, %s375_s7 }
   0x8   : > { %p22_p1 = scmp.eq.s32.totalorder %s21_s14, 0  ;;  %p32_p2 = scmp.eq.s32.totalorder %s383_s9, 0 }
   0x9   : > { %p37_p3 = scmp.ne.s32.totalorder %s375_s7, %s371_s6  ;;  %p38_p4 = scmp.eq.s32.totalorder %s418_s10, 0 }
   0xa   : > { %s434_s15 = scalar_select %p22_p1, %s379_s8, %s24_s13  }
   0xb   : > { %p436_p5 = por %p32_p2, %p31_p0  ;;  %p440_p6 = por %p38_p4, %p37_p3 }
   0xc   : > { %p61_p7 = scmp.eq.s32.totalorder %s418_s10, 1  ;;  %p67_p8 = scmp.eq.s32.totalorder %s224_s11, 1 }
   0xd   : > { %p249_p10 = scmp.lt.s32.totalorder %s383_s9, 2  ;;  %s87_s20 = sand.u32 1, %s379_s8  }
   0xe   : > { %p447_p11 = por %p61_p7, %p31_p0  ;;  %p451_p12 = por %p67_p8, %p37_p3 }
   0xf   : > { %s228_s21 = sshll.u32 %s383_s9, 7  ;;  %s227_s22 = sshll.u32 %s87_s20, 3 }
  0x10   : > { %s563_s18 = scalar_select %p447_p11, 1, 0 }
  0x11   : > { %s564_s19 = scalar_select %p451_p12, 1, 0 }
  0x12   : > { %s460_s25 = scalar_lea.hbm %s558_s0, %s228_s21  ;;  %s91_s26 = scalar_lea.vmem [#allocation2], %s227_s22 }
  0x13   : > { %s98_s27 = sshll.u32 %s91_s26, 4  ;;  %p464_p13 = pnand %p249_p10, %p436_p5  ;;  %s468_s27 = int_to_ptr.vmem [resolvable:$true] %s98_s27 }
  0x14   : > { %s88_s29 = scalar_lea.sflag [#allocation3], %s87_s20  ;;  %s287_s30 = scalar_lea.hbm %s460_s25, 128 }
  0x15   : > { %p288_p2 = scmp.ne.s32.totalorder %s460_s25, %s287_s30  ;;  %p289_p3 = pneg %p464_p13 }
  0x16   : > { %s292_s4 = scalar_lea.hbm %s558_s0, 256  ;;  %p293_p5 = scmp.lt.u32.totalorder %s460_s25, %s558_s0 }
  0x17   : > { %p290_p4 = pnand %p289_p3, %p288_p2  ;;  %p294_p8 = scmp.lt.u32.totalorder %s292_s4, %s287_s30 }
  0x18   : > { %p296_p9 = scmp.lt.u32.totalorder %s287_s30, %s460_s25 }
  0x19   : > { %p291_p7 = pneg %p290_p4  ;;  %p295_p10 = por %p294_p8, %p293_p5 }
  0x1b   : > { %p297_p0 = por %p296_p9, %p295_p10 }
  0x1d   : > { %p298_p1 = pnand %p297_p0, %p291_p7 }
  0x1f   : > { %301 = shalt.err (!%p298_p1)
}
  0x20   : > { %s302_s13 = scalar_lea.vmem %s468_s27, 128  ;;  %s385_s14 = smov [#allocation2]  }
  0x21   : > { %p303_p2 = scmp.ne.s32.totalorder %s468_s27, %s302_s13  ;;  %s307_s16 = sshll.u32 %s385_s14, 4  ;;  %s308_s16 = int_to_ptr.vmem [resolvable:$false] %s307_s16 }
  0x22   : > { %s309_s20 = scalar_lea.vmem %s308_s16, 256  ;;  %p310_p11 = scmp.lt.s32.totalorder %s468_s27, %s308_s16 }
  0x23   : > { %p305_p4 = pnand %p303_p2, %p289_p3  ;;  %p311_p5 = scmp.lt.s32.totalorder %s309_s20, %s302_s13 }
  0x25   : > { %p306_p12 = pneg %p305_p4  ;;  %p312_p8 = por %p311_p5, %p310_p11 }
  0x27   : > { %p313_p9 = pnand %p312_p8, %p306_p12 }
  0x29   : > { %316 = shalt.err (!%p313_p9)
}
  0x2a   : > { %244 = dma.hbm_to_vmem [thread:$0]  (!%p464_p13), %s460_s25, 128, %s468_s27, %s88_s29  }
  0x2b   : > { %p566_p0 = scmp.lt.s32.totalorder %s383_s9, 3  ;;  %p567_p1 = scmp.ge.s32.totalorder %s383_s9, 1 }
  0x2d   : > { %p104_p3 = pnand %p567_p1, %p566_p0 }
  0x2e   : > { %s502_s21 = sand.u32 (!%p104_p3), 1, %s375_s7  }
  0x2f   : > { %107 = sbr.rel (%p104_p3) target bundleno = 96 (0x60), region = 24  ;;  %s230_s22 = sshll.u32 (!%p104_p3), %s502_s21, 3 }
  0x30   : > { %s110_s23 = scalar_lea.sflag (!%p104_p3), [#allocation3], %s502_s21  ;;  %s113_s24 = scalar_lea.vmem (!%p104_p3), [#allocation2], %s230_s22 }
  0x36   : > { %362 = dma.done.wait (%p440_p6), %s110_s23, 128  }
  0x37   : > { %364 = vsyncadd (%p440_p6), %s110_s23, 4294967168  ;;  %v132_v0 = vld [vmem:[%s113_s24] sm:$0xff]  ;;  %s131_s25 = scalar_lea.vmem [#allocation5], %s230_s22  ;;  %s234_s27 = sshll.u32 %s418_s10, 7 }
  0x38   : > { %v232_v1 = vmul.f32 -1.442695, %v132_v0  ;;  %s154_s26 = sshll.u32 %s131_s25, 4  ;;  %s516_s17 = scalar_lea.hbm %s559_s1, %s234_s27  ;;  %s511_s26 = int_to_ptr.vmem [resolvable:$true] %s154_s26 }
  0x39   : > { %s141_s30 = scalar_lea.sflag [#allocation4], %s502_s21  ;;  %s317_s2 = scalar_lea.vmem %s511_s26, 128 }
  0x3a   : > { %283 = vpow2.f32 %v232_v1  ;;  %p318_p6 = scmp.ne.s32.totalorder %s511_s26, %s317_s2  ;;  %p568_p11 = scmp.ne.s32.totalorder %s563_s18, 0 }
  0x3b   : > { %s386_s3 = smov [#allocation5]  }
  0x3c   : > { %p319_p12 = pnand %p318_p6, %p568_p11  ;;  %s321_s10 = sshll.u32 %s386_s3, 4  ;;  %s322_s10 = int_to_ptr.vmem [resolvable:$false] %s321_s10 }
  0x3d   : > { %s323_s4 = scalar_lea.vmem %s322_s10, 256  ;;  %p324_p7 = scmp.lt.s32.totalorder %s511_s26, %s322_s10 }
  0x3e   : > { %p320_p13 = pneg %p319_p12  ;;  %p325_p10 = scmp.lt.s32.totalorder %s323_s4, %s317_s2 }
  0x40   : > { %p326_p2 = por %p325_p10, %p324_p7 }
  0x42   : > { %p327_p4 = pnand %p326_p2, %p320_p13 }
  0x44   : > { %v284_v2 = vpop.eup %283 }
  0x45   : > { %v136_v3 = vadd.f32 1.0, %v284_v2 }
  0x47   : > { %285 = vrcp.f32 %v136_v3 }
  0x51   : > { %v286_v4 = vpop.eup %285 }
  0x52   : > { %139 = vst [vmem:[%s131_s25] sm:$0xff] %v286_v4 }
  0x53   : > { %330 = shalt.err (!%p327_p4)
}
  0x54   : > { %s331_s5 = scalar_lea.hbm %s516_s17, 128  ;;  %s335_s14 = scalar_lea.hbm %s559_s1, 256 }
  0x55   : > { %p332_p5 = scmp.ne.s32.totalorder %s516_s17, %s331_s5  ;;  %p336_p0 = scmp.lt.u32.totalorder %s516_s17, %s559_s1 }
  0x56   : > { %p337_p1 = scmp.lt.u32.totalorder %s335_s14, %s331_s5  ;;  %p339_p6 = scmp.lt.u32.totalorder %s331_s5, %s516_s17 }
  0x57   : > { %p333_p8 = pnand %p332_p5, %p568_p11 }
  0x58   : > { %p338_p3 = por %p337_p1, %p336_p0 }
  0x59   : > { %p334_p9 = pneg %p333_p8 }
  0x5a   : > { %p340_p12 = por %p339_p6, %p338_p3 }
  0x5c   : > { %p341_p13 = pnand %p340_p12, %p334_p9 }
  0x5e   : > { %344 = shalt.err (!%p341_p13)
}
  0x5f   : > { %239 = dma.vmem_to_hbm [thread:$0]  (%p568_p11), %s511_s26, 128, %s516_s17, %s141_s30  }
  0x60 PF: > { %s166_s21 = sand.u32 1, %s371_s6   ;;  %p569_p7 = scmp.ne.s32.totalorder %s564_s19, 0 }
  0x61   : > { %p570_p10 = scmp.ge.s32.totalorder %s383_s9, 2  ;;  %s167_s22 = scalar_lea.sflag [#allocation4], %s166_s21 }
  0x63   : > { %p246_p2 = pnand %p570_p10, %p569_p7 }
  0x65   : > { %366 = dma.done.wait (!%p246_p2), %s167_s22, 128  }
  0x66   : > { %368 = vsyncadd (!%p246_p2), %s167_s22, 4294967168  ;;  %p14_p4 = scmp.ge.s32.totalorder %s422_s12, 4   ;;  %s571_s6 = smov %s375_s7 }
  0x67   : > { %s572_s7 = smov %s379_s8  ;;  %s573_s8 = smov %s434_s15 }
  0x68   : > { %s574_s9 = smov %s422_s12  ;;  %16 = sbr.rel (!%p14_p4) target bundleno = 5 (0x5), region = 69 }
  0x6f   :  { %172 = vsyncpa [#allocation3], 1 }
  0x70   :  { %174 = vsyncpa [#allocation3 + $0x1], 1 }
  0x71   :  { %175 = vsyncpa [#allocation4], 1 }
  0x72   :  { %177 = vsyncpa [#allocation4 + $0x1], 1 }

</bundles_post_ra>
